<compile_context>
chip_gen: v7x
topology: tpu7x:2x2x1
jax: 0.10.0
libtpu: 0.0.40
codegen_flags: <defaults>
</compile_context>

<pallas_src>
import functools

import jax
import jax.numpy as jnp
from jax.experimental import pallas as pl
from jax.experimental.pallas import tpu as pltpu


# ---------------------------------------------------------------------------
# Kernels
# ---------------------------------------------------------------------------
def _qkv_kernel_single_k(x_ref, w_ref, b_ref, o_ref):
    """Whole reduction in one MXU pass; bias added in the same epilogue store."""
    o_ref[...] = (
        jnp.dot(x_ref[...], w_ref[...], preferred_element_type=jnp.float32)
        + b_ref[...]
    ).astype(o_ref.dtype)


def _qkv_kernel_multi_k(x_ref, w_ref, b_ref, o_ref, acc_ref):
    """K-tiled path (only used when h_dim is too large for a single K step)."""
    k_step = pl.program_id(2)

    @pl.when(k_step == 0)
    def _():
        # Bias folded into the accumulator init: no zeros pass, no epilogue add.
        acc_ref[...] = jnp.broadcast_to(b_ref[...], acc_ref.shape)

    acc_ref[...] += jnp.dot(
        x_ref[...], w_ref[...], preferred_element_type=jnp.float32
    )

    @pl.when(k_step == pl.num_programs(2) - 1)
    def _():
        o_ref[...] = acc_ref[...].astype(o_ref.dtype)


# ---------------------------------------------------------------------------
# Tiling helpers
# ---------------------------------------------------------------------------
def _round_up(v, m):
    return -(-v // m) * m


def _choose_tile(dim, target, aligns=(256, 128)):
    """Full-extent block for small dims, else the largest aligned divisor of
    `dim` that is <= target (so no padding is ever required on that axis)."""
    if dim <= target:
        return dim
    for align in aligns:
        t = (target // align) * align
        while t >= align:
            if dim % t == 0:
                return t
            t -= align
    return dim  # no clean divisor: fall back to a full-extent block


# ---------------------------------------------------------------------------
# One-time parameter preparation (hoisted out of the per-call hot path)
# ---------------------------------------------------------------------------
def prepare_params(params, compute_dtype=jnp.bfloat16):
    """Fuse Wq|Wk|Wv into one wide matrix and bq|bk|bv into one bias row.

    Call ONCE (e.g. at model load); the fused tensors are then streamed
    directly by the kernel with no per-call concat / pad / cast HBM traffic.
    Weights are (h_dim, out_dim) i.e. transposed vs. PyTorch Linear.weight.
    """
    wq, bq, wk, bk, wv, bv = params

    def _b2d(b):  # accept torch-style 1-D biases as well as (1, fan_out)
        return b.reshape(1, -1)

    w = jnp.concatenate([wq, wk, wv], axis=1).astype(compute_dtype)
    b = jnp.concatenate([_b2d(bq), _b2d(bk), _b2d(bv)], axis=1).astype(jnp.float32)
    return w, b


# ---------------------------------------------------------------------------
# Wrapper
# ---------------------------------------------------------------------------
@functools.partial(
    jax.jit, static_argnames=("num_heads", "tm", "tn", "tk", "out_dtype")
)
def qkv_lin(x, w_fused, b_fused, *, num_heads, tm=512, tn=512, tk=None,
            out_dtype=None):
    """x: (n, h_dim) -> [q, k, v], each (n, num_heads, -1)."""
    n, h_dim = x.shape
    out_dim = w_fused.shape[1]
    key_dim = (out_dim - h_dim) // 2
    out_dtype = x.dtype if out_dtype is None else out_dtype
    compute_dtype = w_fused.dtype

    # ----- tile selection (reduction collapsed to one step whenever it fits) -
    tn = _choose_tile(out_dim, tn, (256, 128))
    if tk is None:
        tk = _choose_tile(h_dim, 2048, (256, 128))
    assert tk == h_dim or (h_dim % tk == 0 and tk % 128 == 0), (
        "tk must divide h_dim and be a multiple of 128 (or equal h_dim)")
    if n < tm:
        tm = _round_up(n, 16)            # small-n: one sublane-friendly tile
    n_p = _round_up(n, tm)

    # Only cheap row padding on x; K and the fused weights are never padded.
    x_p = x.astype(compute_dtype)
    if n_p != n:
        x_p = jnp.pad(x_p, ((0, n_p - n), (0, 0)))

    n_tiles = n_p // tm
    o_tiles = out_dim // tn
    k_steps = h_dim // tk

    # Grid ordering: keep the larger streamed operand VMEM-resident across the
    # inner axis; both non-reduction axes are "parallel" for the v7x megacore.
    rows_outer = n_p >= out_dim

    if k_steps == 1:
        kernel = _qkv_kernel_single_k
        scratch = []
        if rows_outer:
            grid = (n_tiles, o_tiles)
            x_map = lambda i, j: (i, 0)
            w_map = lambda i, j: (0, j)
            b_map = lambda i, j: (0, j)
            o_map = lambda i, j: (i, j)
        else:
            grid = (o_tiles, n_tiles)
            x_map = lambda j, i: (i, 0)
            w_map = lambda j, i: (0, j)
            b_map = lambda j, i: (0, j)
            o_map = lambda j, i: (i, j)
        dims = ("parallel", "parallel")
    else:
        kernel = _qkv_kernel_multi_k
        scratch = [pltpu.VMEM((tm, tn), jnp.float32)]
        if rows_outer:
            grid = (n_tiles, o_tiles, k_steps)
            x_map = lambda i, j, k: (i, k)
            w_map = lambda i, j, k: (k, j)
            b_map = lambda i, j, k: (0, j)
            o_map = lambda i, j, k: (i, j)
        else:
            grid = (o_tiles, n_tiles, k_steps)
            x_map = lambda j, i, k: (i, k)
            w_map = lambda j, i, k: (k, j)
            b_map = lambda j, i, k: (0, j)
            o_map = lambda j, i, k: (i, j)
        dims = ("parallel", "parallel", "arbitrary")

    in_isize = jnp.dtype(compute_dtype).itemsize
    out_isize = jnp.dtype(out_dtype).itemsize
    cost = pl.CostEstimate(
        flops=2 * n_p * h_dim * out_dim,
        transcendentals=0,
        bytes_accessed=(n_p * h_dim * in_isize + h_dim * out_dim * in_isize
                        + out_dim * 4 + n_p * out_dim * out_isize),
    )
    # Double-buffered x / W / out tiles + bias (+ f32 acc on the multi-K path),
    # with 2x headroom; floor 32 MiB, cap 48 MiB (safe even on v7x's 64 MiB).
    vmem_bytes = (
        2 * (tm * tk + tk * tn) * in_isize
        + 2 * tn * 4
        + 2 * tm * tn * out_isize
        + (tm * tn * 4 if k_steps > 1 else 0)
    )
    vmem_limit = min(max(2 * vmem_bytes, 32 * 1024 * 1024), 48 * 1024 * 1024)

    fused = pl.pallas_call(
        kernel,
        out_shape=jax.ShapeDtypeStruct((n_p, out_dim), out_dtype),
        grid_spec=pltpu.PrefetchScalarGridSpec(
            num_scalar_prefetch=0,
            grid=grid,
            in_specs=[
                pl.BlockSpec((tm, tk), x_map),   # activations (bf16)
                pl.BlockSpec((tk, tn), w_map),   # fused weight panel (bf16)
                pl.BlockSpec((1, tn), b_map),    # fused bias (f32)
            ],
            out_specs=pl.BlockSpec((tm, tn), o_map),
            scratch_shapes=scratch,
        ),
        compiler_params=pltpu.CompilerParams(
            dimension_semantics=dims,
            vmem_limit_bytes=vmem_limit,
        ),
        cost_estimate=cost,
    )(x_p, w_fused, b_fused)

    fused = fused[:n]
    q = fused[:, :key_dim].reshape(n, num_heads, -1)
    k = fused[:, key_dim:2 * key_dim].reshape(n, num_heads, -1)
    v = fused[:, 2 * key_dim:].reshape(n, num_heads, -1)
    return [q, k, v]


# ---------------------------------------------------------------------------
# Init + reference (for the self-test)
# ---------------------------------------------------------------------------
def init_params(key, h_dim, key_dim):
    """PyTorch-Linear-like init; weights stored transposed (fan_in, fan_out),
    biases stored 1-D (torch-style) to exercise the defensive reshape."""
    ks = jax.random.split(key, 6)

    def lin(kw, kb, fan_in, fan_out):
        bound = 1.0 / jnp.sqrt(fan_in)
        w = jax.random.uniform(kw, (fan_in, fan_out), jnp.float32, -bound, bound)
        b = jax.random.uniform(kb, (fan_out,), jnp.float32, -bound, bound)
        return w, b

    wq, bq = lin(ks[0], ks[1], h_dim, key_dim)
    wk, bk = lin(ks[2], ks[3], h_dim, key_dim)
    wv, bv = lin(ks[4], ks[5], h_dim, h_dim)
    return (wq, bq, wk, bk, wv, bv)


def _reference(x, params, num_heads, compute_dtype=jnp.bfloat16):
    n = x.shape[0]
    wq, bq, wk, bk, wv, bv = params

    def lin(w, b):
        y = jnp.dot(x.astype(compute_dtype), w.astype(compute_dtype),
                    preferred_element_type=jnp.float32) + b.reshape(1, -1)
        return y.reshape(n, num_heads, -1)

    return [lin(wq, bq), lin(wk, bk), lin(wv, bv)]


if __name__ == "__main__":
    root = jax.random.PRNGKey(0)
    k1, k2, k3, k4, k5, k6 = jax.random.split(root, 6)

    # --- (a) small shapes: full-extent blocks, single K step, cols-outer ---
    n, h_dim, key_dim, heads = 8, 32, 16, 4
    x = jax.random.normal(k1, (n, h_dim), jnp.float32)
    params = init_params(k2, h_dim, key_dim)
    w_f, b_f = prepare_params(params)          # fused once, outside the hot path

    q, kk, v = qkv_lin(x, w_f, b_f, num_heads=heads)
    jax.block_until_ready((q, kk, v))

    assert q.shape == (n, heads, key_dim // heads)
    assert kk.shape == (n, heads, key_dim // heads)
    assert v.shape == (n, heads, h_dim // heads)
    qr, kr, vr = _reference(x, params, heads)                   # bf16-input ref
    for a, b in zip((q, kk, v), (qr, kr, vr)):
        assert jnp.allclose(a, b, atol=1e-4, rtol=1e-4), float(jnp.abs(a - b).max())
    qf, kf, vf = _reference(x, params, heads, compute_dtype=jnp.float32)
    for a, b in zip((q, kk, v), (qf, kf, vf)):                  # loose f32 sanity
        assert jnp.allclose(a, b, atol=5e-2, rtol=5e-2)

    # --- (b) multi-K accumulator path (tk=128 -> 3 K steps), bias-in-init,
    #         row padding 192 -> 256, cols-outer grid ---
    n2, h2, kd2, heads2 = 192, 384, 128, 4
    x2 = jax.random.normal(k3, (n2, h2), jnp.float32)
    params2 = init_params(k4, h2, kd2)
    w2, b2 = prepare_params(params2)
    q2, k2_, v2 = qkv_lin(x2, w2, b2, num_heads=heads2, tm=128, tn=128, tk=128)
    jax.block_until_ready((q2, k2_, v2))
    q2r, k2r, v2r = _reference(x2, params2, heads2)
    for a, b in zip((q2, k2_, v2), (q2r, k2r, v2r)):
        assert jnp.allclose(a, b, atol=1e-4, rtol=1e-4), float(jnp.abs(a - b).max())

    # --- (c) rows-outer ordering (n > out_dim), single K step, row padding ---
    n3, h3, kd3, heads3 = 150, 64, 32, 4
    x3 = jax.random.normal(k5, (n3, h3), jnp.float32)
    params3 = init_params(k6, h3, kd3)
    w3, b3 = prepare_params(params3)
    q3, k3_, v3 = qkv_lin(x3, w3, b3, num_heads=heads3)
    jax.block_until_ready((q3, k3_, v3))
    q3r, k3r, v3r = _reference(x3, params3, heads3)
    for a, b in zip((q3, k3_, v3), (q3r, k3r, v3r)):
        assert jnp.allclose(a, b, atol=1e-4, rtol=1e-4), float(jnp.abs(a - b).max())

    print("KERNEL_OK")
</pallas_src>

<mosaic_0001>
module attributes {stable_mosaic.version = 11 : i64} {
  func.func @_qkv_kernel_single_k(%arg0: i32, %arg1: i32, %arg2: memref<16x32xbf16, #tpu.memory_space<vmem>>, %arg3: memref<32x64xbf16, #tpu.memory_space<vmem>>, %arg4: memref<1x64xf32, #tpu.memory_space<vmem>>, %arg5: memref<16x64xf32, #tpu.memory_space<vmem>>) attributes {dimension_semantics = [#tpu.dimension_semantics<parallel>, #tpu.dimension_semantics<parallel>], iteration_bounds = array<i64: 1, 1>, scalar_prefetch = 0 : i64, scratch_operands = 0 : i64, tpu.core_type = #tpu.core_type<tc>, window_params = [{transform_indices = @transform_0, window_bounds = array<i64: 16, 32>}, {transform_indices = @transform_1, window_bounds = array<i64: 32, 64>}, {transform_indices = @transform_2, window_bounds = array<i64: 1, 64>}, {transform_indices = @transform_3, window_bounds = array<i64: 16, 64>}]} {
    %c0 = arith.constant 0 : index
    %c0_0 = arith.constant 0 : index
    %0 = vector.load %arg2[%c0, %c0_0] : memref<16x32xbf16, #tpu.memory_space<vmem>>, vector<16x32xbf16>
    %c0_1 = arith.constant 0 : index
    %c0_2 = arith.constant 0 : index
    %1 = vector.load %arg3[%c0_1, %c0_2] : memref<32x64xbf16, #tpu.memory_space<vmem>>, vector<32x64xbf16>
    %cst = arith.constant dense<0.000000e+00> : vector<16x64xf32>
    %2 = tpu.matmul %0, %1, %cst {dimension_numbers = #tpu.dot_dimension_numbers<[1], [0], [0], [1], [0, 0, 1, 1], [], []>} : vector<16x32xbf16>, vector<32x64xbf16>, vector<16x64xf32> -> vector<16x64xf32>
    %c0_3 = arith.constant 0 : index
    %c0_4 = arith.constant 0 : index
    %3 = vector.load %arg4[%c0_3, %c0_4] : memref<1x64xf32, #tpu.memory_space<vmem>>, vector<1x64xf32>
    %4 = vector.broadcast %3 : vector<1x64xf32> to vector<16x64xf32>
    %5 = arith.addf %2, %4 : vector<16x64xf32>
    %c0_5 = arith.constant 0 : index
    %c0_6 = arith.constant 0 : index
    %6 = vector.load %arg5[%c0_5, %c0_6] : memref<16x64xf32, #tpu.memory_space<vmem>>, vector<16x64xf32>
    tpu.vector_store %arg5[%c0_5, %c0_6], %5 {strides = array<i32>} : memref<16x64xf32, #tpu.memory_space<vmem>>, vector<16x64xf32>,
    return
  }
  func.func @transform_0(%arg0: i32, %arg1: i32) -> (i32, i32) {
    %c0_i32 = arith.constant 0 : i32
    %c0_i32_0 = arith.constant 0 : i32
    return %arg1, %c0_i32 : i32, i32
  }
  func.func @transform_1(%arg0: i32, %arg1: i32) -> (i32, i32) {
    %c0_i32 = arith.constant 0 : i32
    %c0_i32_0 = arith.constant 0 : i32
    return %c0_i32, %arg0 : i32, i32
  }
  func.func @transform_2(%arg0: i32, %arg1: i32) -> (i32, i32) {
    %c0_i32 = arith.constant 0 : i32
    %c0_i32_0 = arith.constant 0 : i32
    return %c0_i32, %arg0 : i32, i32
  }
  func.func @transform_3(%arg0: i32, %arg1: i32) -> (i32, i32) {
    %c0_i32 = arith.constant 0 : i32
    return %arg1, %arg0 : i32, i32
  }
}

</mosaic_0001>

<bundles_post_ra>
// kernel: qkv_lin.1
= control target key start
LH: loop header
LB: loop body
LE: loop exit
PB: predicated region body
PF: predicated region fallthrough
CT: control target
= control target key end

     0   :  { %v118_v0 = vmov 0.0   ;;  %vm119_vm0 = vmmov 0   ;;  %vm45_vm1 = vcmask 261120   ;;  %vm90_vm2 = vcmask 523264   ;;  %s158_s1 = inlined_call_operand.vmem [shape: bf16[32,64], index: 1, kind: input, shape index: {}]   ;;  %s159_s0 = inlined_call_operand.vmem [shape: bf16[16,32], index: 0, kind: input, shape index: {}]   ;;  %s160_s2 = inlined_call_operand.vmem [shape: f32[1,64], index: 2, kind: input, shape index: {}]   ;;  %s161_s3 = inlined_call_operand.vmem [shape: f32[16,64], index: 3, kind: output, shape index: {}]  }
   0x1   :  { %105 = vmatprep.subr.bf16.mxu0 %v118_v0  ;;  %v115_v1 = vld [vmem:[%s158_s1] sm:$0xff]   ;;  %109 = vmatprep.mubr.msk.bf16.mxu0 %vm119_vm0, %v118_v0  ;;  %v116_v2 = vld [vmem:[%s158_s1 + $0x8] sm:$0xff]  }
   0x2   :  { %106 = vmatpush3.bf16.msra.mxu0 %v115_v1  ;;  %v117_v3 = vld [vmem:[%s159_s0] sm:$0xff]  }
   0x3   :  { %107 = vmatprep.subr.bf16.mxu0 %v118_v0  ;;  %v97_v4 = vld [vmem:[%s160_s2] ss:$0 sm:$0xff] }
   0x6   :  { %108 = vmatpush3.bf16.msra.mxu0 %v116_v2 }
   0x9   :  { %110 = vmatmul.mubr.msk.bf16.vlgmr.msra.gmra.mrb[0].mxu0 %vm45_vm1, %v117_v3 }
  0xdc   :  { %v83_v5 = vpop.f32.mrb[0].mxu0 }
  0xdd   :  { %v84_v6 = vadd.f32 %v97_v4, %v83_v5  ;;  %v111_v7 = vpop.f32.mrb[1].mxu0 }
  0xde   :  { %v86_v8 = vpop.f32.mrb[2].mxu0 }
  0xdf   :  { %91 = vst.msk [vmem:[%s161_s3] sm:$0xff] %vm90_vm2, %v84_v6  ;;  %v87_v9 = vadd.f32 %v97_v4, %v86_v8  ;;  %v112_v10 = vpop.f32.mrb[3].mxu0 }
  0xe1   :  { %92 = vst.msk [vmem:[%s161_s3 + $0x8] sm:$0xff] %vm90_vm2, %v87_v9 }

</bundles_post_ra>
